<compile_context>
chip_gen: v7x
topology: tpu7x:2x2x1
jax: 0.10.0
libtpu: 0.0.40
codegen_flags: <defaults>
</compile_context>

<pallas_src>
import functools

import jax
import jax.numpy as jnp
from jax.experimental import pallas as pl
from jax.experimental.pallas import tpu as pltpu


# ---------------------------------------------------------------------------
# Kernels
# ---------------------------------------------------------------------------

def layernorm_kernel(x_ref, gamma_ref, beta_ref, o_ref, *, eps, hidden):
    """Standard path: one logical row per physical row (hidden is the lane dim)."""
    x = x_ref[...].astype(jnp.float32)                        # (tile_rows, hidden)
    # Single pass: sum and sum-of-squares together (independent XLU reduces).
    s = jnp.sum(x, axis=-1, keepdims=True)                    # (tile_rows, 1)
    sq = jnp.sum(x * x, axis=-1, keepdims=True)               # (tile_rows, 1)
    inv_h = 1.0 / hidden
    mean = s * inv_h
    # torch.std is unbiased (ddof=1); eps is added to std, not to var.
    var = (sq * inv_h - mean * mean) * (hidden / (hidden - 1.0))
    var = jnp.maximum(var, 0.0)                               # guard f32 cancellation
    inv = pl.reciprocal(jnp.sqrt(var) + eps, approx=False)    # per-row column
    out = (x - mean) * inv * gamma_ref[...] + beta_ref[...]
    o_ref[...] = out.astype(o_ref.dtype)


def layernorm_kernel_packed(x_ref, gamma_ref, beta_ref, o_ref, *, eps, hidden):
    """Lane-dense path for tiny hidden (power-of-two divisor of 128).

    Each physical row holds k = 128 // hidden logical rows side by side, so the
    in/out tiles are 128-lane dense.  Segment statistics are computed with a
    circular-within-segment butterfly: exact f32, XLU rolls + VPU selects.
    """
    x = x_ref[...].astype(jnp.float32)                        # (tile_rows, 128)
    lanes = x.shape[-1]
    lane_off = jax.lax.broadcasted_iota(jnp.int32, (1, lanes), 1) % hidden

    def seg_allreduce(v):
        shift = 1
        while shift < hidden:                                  # log2(hidden) steps
            rolled_in = pltpu.roll(v, shift, axis=1)
            rolled_wrap = pltpu.roll(v, (shift - hidden) % lanes, axis=1)
            v = v + jnp.where(lane_off >= shift, rolled_in, rolled_wrap)
            shift *= 2
        return v

    s = seg_allreduce(x)                                      # segment sums (bcast)
    sq = seg_allreduce(x * x)                                 # segment sumsq (bcast)
    inv_h = 1.0 / hidden
    mean = s * inv_h
    var = (sq * inv_h - mean * mean) * (hidden / (hidden - 1.0))
    var = jnp.maximum(var, 0.0)
    inv = pl.reciprocal(jnp.sqrt(var) + eps, approx=False)
    out = (x - mean) * inv * gamma_ref[...] + beta_ref[...]
    o_ref[...] = out.astype(o_ref.dtype)


# ---------------------------------------------------------------------------
# Wrapper
# ---------------------------------------------------------------------------

def _pick_tiling(rows, width, itemsize):
    """Choose tile_rows and a scoped-VMEM limit that fit the current chip."""
    try:
        vmem_cap = int(pltpu.get_tpu_info().vmem_capacity_bytes)
    except Exception:  # be robust if introspection is unavailable
        vmem_cap = 64 * 1024 * 1024  # conservative (v7x per-TC)

    # Clamp to 48 MiB: keeps headroom on v7x (64 MiB/TC physical; get_tpu_info
    # may report the per-chip figure) and is ample for v5e/v6e streaming tiles.
    vmem_limit = min(vmem_cap // 2, 48 * 1024 * 1024)

    # Per-row cost: double-buffered input + output tile (native dtype) plus
    # ~3 f32 full-width intermediates.
    per_row = 2 * 2 * width * itemsize + 3 * width * 4
    budget = int(vmem_limit * 0.6)

    align = 16 if itemsize == 2 else 8
    tile_rows = budget // max(per_row, 1)
    tile_rows = max(align, min(tile_rows, 1024))
    tile_rows = (tile_rows // align) * align

    if rows <= align:
        return rows, vmem_limit            # single full-array tile (always legal)

    rows_aligned = ((rows + align - 1) // align) * align
    tile_rows = min(tile_rows, rows_aligned)

    # v7x has 2 TensorCores: give the "parallel" grid axis >= 2 steps whenever
    # there are enough rows, so both cores (and both HBM shares) get work.
    if rows >= 2 * align and pl.cdiv(rows, tile_rows) < 2:
        half = (((rows + 1) // 2) + align - 1) // align * align
        tile_rows = min(tile_rows, max(align, half))

    return tile_rows, vmem_limit


def _run(kernel, x2d, gamma2d, beta2d, tile_rows, vmem_limit):
    rows, width = x2d.shape
    grid = (pl.cdiv(rows, tile_rows),)
    return pl.pallas_call(
        kernel,
        out_shape=jax.ShapeDtypeStruct((rows, width), x2d.dtype),
        grid_spec=pltpu.PrefetchScalarGridSpec(
            num_scalar_prefetch=0,
            grid=grid,
            in_specs=[
                pl.BlockSpec((tile_rows, width), lambda i: (i, 0)),
                pl.BlockSpec((1, width), lambda i: (0, 0)),   # VMEM-resident gamma
                pl.BlockSpec((1, width), lambda i: (0, 0)),   # VMEM-resident beta
            ],
            out_specs=pl.BlockSpec((tile_rows, width), lambda i: (i, 0)),
        ),
        compiler_params=pltpu.CompilerParams(
            dimension_semantics=("parallel",),   # shard rows across v7x's 2 TCs
            vmem_limit_bytes=vmem_limit,
        ),
    )(x2d, gamma2d, beta2d)


def layer_norm(x, gamma, beta, eps=1e-6):
    """x: (..., hidden). gamma, beta: (hidden,). Matches the torch module."""
    orig_shape = x.shape
    hidden = orig_shape[-1]
    if hidden < 2:
        raise ValueError("hidden must be >= 2 (unbiased std uses hidden - 1)")

    x2d = x.reshape(-1, hidden)
    rows = x2d.shape[0]
    itemsize = jnp.dtype(x.dtype).itemsize

    gamma_f32 = gamma.reshape(-1).astype(jnp.float32)   # hoisted cast (per feedback)
    beta_f32 = beta.reshape(-1).astype(jnp.float32)

    packable = hidden < 128 and (128 % hidden == 0)
    if packable:
        # Lane-dense packing: k logical rows per physical 128-lane row.
        k = 128 // hidden
        width = 128
        rows_p = -(-rows // k)
        pad = rows_p * k - rows
        if pad:
            x2d = jnp.pad(x2d, ((0, pad), (0, 0)))
        x_in = x2d.reshape(rows_p, width)
        gamma_in = jnp.tile(gamma_f32, (k,)).reshape(1, width)
        beta_in = jnp.tile(beta_f32, (k,)).reshape(1, width)
        kernel = functools.partial(layernorm_kernel_packed, eps=eps, hidden=hidden)
        n_rows = rows_p
    else:
        width = hidden
        x_in = x2d
        gamma_in = gamma_f32.reshape(1, width)
        beta_in = beta_f32.reshape(1, width)
        kernel = functools.partial(layernorm_kernel, eps=eps, hidden=hidden)
        n_rows = rows

    tile_rows, vmem_limit = _pick_tiling(n_rows, width, itemsize)
    out = _run(kernel, x_in, gamma_in, beta_in, tile_rows, vmem_limit)

    if packable:
        out = out.reshape(rows_p * k, hidden)
        if pad:
            out = out[:rows]
    return out.reshape(orig_shape)


# ---------------------------------------------------------------------------
# Demo / self-check
# ---------------------------------------------------------------------------

if __name__ == "__main__":
    eps = 1e-6

    # Packed (lane-dense, hidden=32) path — matches the module's demo shape.
    key = jax.random.PRNGKey(0)
    batch, seq, hidden = 2, 8, 32
    x = jax.random.normal(key, (batch, seq, hidden), dtype=jnp.float32)
    gamma = jnp.ones((hidden,), dtype=jnp.float32)   # nn.Parameter(torch.ones)
    beta = jnp.zeros((hidden,), dtype=jnp.float32)   # nn.Parameter(torch.zeros)

    out = jax.block_until_ready(layer_norm(x, gamma, beta, eps=eps))

    mean = jnp.mean(x, axis=-1, keepdims=True)
    std = jnp.sqrt(jnp.sum((x - mean) ** 2, axis=-1, keepdims=True) / (hidden - 1))
    ref = gamma * (x - mean) / (std + eps) + beta
    assert jnp.allclose(out, ref, atol=1e-4, rtol=1e-5), "mismatch (packed path)"

    # Standard path (hidden multiple of 128) — the production-sized regime.
    hidden2 = 128
    x2 = jax.random.normal(jax.random.PRNGKey(1), (4, 6, hidden2), dtype=jnp.float32)
    g2 = jnp.ones((hidden2,), jnp.float32)
    b2 = jnp.zeros((hidden2,), jnp.float32)
    out2 = jax.block_until_ready(layer_norm(x2, g2, b2, eps=eps))
    mean2 = jnp.mean(x2, axis=-1, keepdims=True)
    std2 = jnp.sqrt(jnp.sum((x2 - mean2) ** 2, axis=-1, keepdims=True) / (hidden2 - 1))
    ref2 = g2 * (x2 - mean2) / (std2 + eps) + b2
    assert jnp.allclose(out2, ref2, atol=1e-4, rtol=1e-5), "mismatch (standard path)"

    print("KERNEL_OK")
</pallas_src>

<mosaic_0001>
module attributes {stable_mosaic.version = 11 : i64} {
  func.func @layernorm_kernel_packed(%arg0: i32, %arg1: memref<4x128xf32, #tpu.memory_space<vmem>>, %arg2: memref<1x128xf32, #tpu.memory_space<vmem>>, %arg3: memref<1x128xf32, #tpu.memory_space<vmem>>, %arg4: memref<4x128xf32, #tpu.memory_space<vmem>>) attributes {dimension_semantics = [#tpu.dimension_semantics<parallel>], iteration_bounds = array<i64: 1>, scalar_prefetch = 0 : i64, scratch_operands = 0 : i64, tpu.core_type = #tpu.core_type<tc>, window_params = [{transform_indices = @transform_0, window_bounds = array<i64: 4, 128>}, {pipeline_mode = #tpu.pipeline_mode<synchronous>, transform_indices = @transform_1, window_bounds = array<i64: 1, 128>}, {pipeline_mode = #tpu.pipeline_mode<synchronous>, transform_indices = @transform_2, window_bounds = array<i64: 1, 128>}, {transform_indices = @transform_3, window_bounds = array<i64: 4, 128>}]} {
    %c0 = arith.constant 0 : index
    %c0_0 = arith.constant 0 : index
    %0 = vector.load %arg1[%c0, %c0_0] : memref<4x128xf32, #tpu.memory_space<vmem>>, vector<4x128xf32>
    %1 = tpu.iota {dimensions = array<i32: 1>} : vector<1x128xi32>
    %c32_i32 = arith.constant 32 : i32
    %c0_i32 = arith.constant 0 : i32
    %2 = arith.cmpi eq, %c32_i32, %c0_i32 : i32
    %c1_i32 = arith.constant 1 : i32
    %3 = arith.select %2, %c1_i32, %c32_i32 : i32
    %4 = vector.broadcast %3 : i32 to vector<1x128xi32>
    %5 = arith.remsi %1, %4 : vector<1x128xi32>
    %c0_i32_1 = arith.constant 0 : i32
    %6 = vector.broadcast %c0_i32_1 : i32 to vector<1x128xi32>
    %7 = arith.cmpi ne, %5, %6 : vector<1x128xi32>
    %c0_i32_2 = arith.constant 0 : i32
    %8 = vector.broadcast %c0_i32_2 : i32 to vector<1x128xi32>
    %9 = arith.cmpi slt, %5, %8 : vector<1x128xi32>
    %c0_i32_3 = arith.constant 0 : i32
    %10 = arith.cmpi slt, %3, %c0_i32_3 : i32
    %11 = vector.broadcast %10 : i1 to vector<1x128xi1>
    %12 = vector.broadcast %11 : vector<1x128xi1> to vector<1x128xi1>
    %13 = arith.xori %9, %12 : vector<1x128xi1>
    %14 = arith.andi %13, %7 : vector<1x128xi1>
    %15 = vector.broadcast %3 : i32 to vector<1x128xi32>
    %16 = arith.addi %5, %15 : vector<1x128xi32>
    %17 = arith.select %14, %16, %5 : vector<1x128xi1>, vector<1x128xi32>
    %c1_i32_4 = arith.constant 1 : i32
    %18 = tpu.dynamic_rotate %0 by %c1_i32_4 dim 1 : vector<4x128xf32>, i32 -> vector<4x128xf32>
    %c97_i32 = arith.constant 97 : i32
    %19 = tpu.dynamic_rotate %0 by %c97_i32 dim 1 : vector<4x128xf32>, i32 -> vector<4x128xf32>
    %c1_i32_5 = arith.constant 1 : i32
    %20 = vector.broadcast %c1_i32_5 : i32 to vector<1x128xi32>
    %21 = arith.cmpi sge, %17, %20 : vector<1x128xi32>
    %22 = vector.shape_cast %21 : vector<1x128xi1> to vector<1x128xi1>
    %23 = vector.broadcast %22 : vector<1x128xi1> to vector<4x128xi1>
    %24 = arith.select %23, %18, %19 : vector<4x128xi1>, vector<4x128xf32>
    %25 = arith.addf %0, %24 : vector<4x128xf32>
    %c2_i32 = arith.constant 2 : i32
    %26 = tpu.dynamic_rotate %25 by %c2_i32 dim 1 : vector<4x128xf32>, i32 -> vector<4x128xf32>
    %c98_i32 = arith.constant 98 : i32
    %27 = tpu.dynamic_rotate %25 by %c98_i32 dim 1 : vector<4x128xf32>, i32 -> vector<4x128xf32>
    %c2_i32_6 = arith.constant 2 : i32
    %28 = vector.broadcast %c2_i32_6 : i32 to vector<1x128xi32>
    %29 = arith.cmpi sge, %17, %28 : vector<1x128xi32>
    %30 = vector.shape_cast %29 : vector<1x128xi1> to vector<1x128xi1>
    %31 = vector.broadcast %30 : vector<1x128xi1> to vector<4x128xi1>
    %32 = arith.select %31, %26, %27 : vector<4x128xi1>, vector<4x128xf32>
    %33 = arith.addf %25, %32 : vector<4x128xf32>
    %c4_i32 = arith.constant 4 : i32
    %34 = tpu.dynamic_rotate %33 by %c4_i32 dim 1 : vector<4x128xf32>, i32 -> vector<4x128xf32>
    %c100_i32 = arith.constant 100 : i32
    %35 = tpu.dynamic_rotate %33 by %c100_i32 dim 1 : vector<4x128xf32>, i32 -> vector<4x128xf32>
    %c4_i32_7 = arith.constant 4 : i32
    %36 = vector.broadcast %c4_i32_7 : i32 to vector<1x128xi32>
    %37 = arith.cmpi sge, %17, %36 : vector<1x128xi32>
    %38 = vector.shape_cast %37 : vector<1x128xi1> to vector<1x128xi1>
    %39 = vector.broadcast %38 : vector<1x128xi1> to vector<4x128xi1>
    %40 = arith.select %39, %34, %35 : vector<4x128xi1>, vector<4x128xf32>
    %41 = arith.addf %33, %40 : vector<4x128xf32>
    %c8_i32 = arith.constant 8 : i32
    %42 = tpu.dynamic_rotate %41 by %c8_i32 dim 1 : vector<4x128xf32>, i32 -> vector<4x128xf32>
    %c104_i32 = arith.constant 104 : i32
    %43 = tpu.dynamic_rotate %41 by %c104_i32 dim 1 : vector<4x128xf32>, i32 -> vector<4x128xf32>
    %c8_i32_8 = arith.constant 8 : i32
    %44 = vector.broadcast %c8_i32_8 : i32 to vector<1x128xi32>
    %45 = arith.cmpi sge, %17, %44 : vector<1x128xi32>
    %46 = vector.shape_cast %45 : vector<1x128xi1> to vector<1x128xi1>
    %47 = vector.broadcast %46 : vector<1x128xi1> to vector<4x128xi1>
    %48 = arith.select %47, %42, %43 : vector<4x128xi1>, vector<4x128xf32>
    %49 = arith.addf %41, %48 : vector<4x128xf32>
    %c16_i32 = arith.constant 16 : i32
    %50 = tpu.dynamic_rotate %49 by %c16_i32 dim 1 : vector<4x128xf32>, i32 -> vector<4x128xf32>
    %c112_i32 = arith.constant 112 : i32
    %51 = tpu.dynamic_rotate %49 by %c112_i32 dim 1 : vector<4x128xf32>, i32 -> vector<4x128xf32>
    %c16_i32_9 = arith.constant 16 : i32
    %52 = vector.broadcast %c16_i32_9 : i32 to vector<1x128xi32>
    %53 = arith.cmpi sge, %17, %52 : vector<1x128xi32>
    %54 = vector.shape_cast %53 : vector<1x128xi1> to vector<1x128xi1>
    %55 = vector.broadcast %54 : vector<1x128xi1> to vector<4x128xi1>
    %56 = arith.select %55, %50, %51 : vector<4x128xi1>, vector<4x128xf32>
    %57 = arith.addf %49, %56 : vector<4x128xf32>
    %58 = arith.mulf %0, %0 : vector<4x128xf32>
    %c1_i32_10 = arith.constant 1 : i32
    %59 = tpu.dynamic_rotate %58 by %c1_i32_10 dim 1 : vector<4x128xf32>, i32 -> vector<4x128xf32>
    %c97_i32_11 = arith.constant 97 : i32
    %60 = tpu.dynamic_rotate %58 by %c97_i32_11 dim 1 : vector<4x128xf32>, i32 -> vector<4x128xf32>
    %c1_i32_12 = arith.constant 1 : i32
    %61 = vector.broadcast %c1_i32_12 : i32 to vector<1x128xi32>
    %62 = arith.cmpi sge, %17, %61 : vector<1x128xi32>
    %63 = vector.shape_cast %62 : vector<1x128xi1> to vector<1x128xi1>
    %64 = vector.broadcast %63 : vector<1x128xi1> to vector<4x128xi1>
    %65 = arith.select %64, %59, %60 : vector<4x128xi1>, vector<4x128xf32>
    %66 = arith.addf %58, %65 : vector<4x128xf32>
    %c2_i32_13 = arith.constant 2 : i32
    %67 = tpu.dynamic_rotate %66 by %c2_i32_13 dim 1 : vector<4x128xf32>, i32 -> vector<4x128xf32>
    %c98_i32_14 = arith.constant 98 : i32
    %68 = tpu.dynamic_rotate %66 by %c98_i32_14 dim 1 : vector<4x128xf32>, i32 -> vector<4x128xf32>
    %c2_i32_15 = arith.constant 2 : i32
    %69 = vector.broadcast %c2_i32_15 : i32 to vector<1x128xi32>
    %70 = arith.cmpi sge, %17, %69 : vector<1x128xi32>
    %71 = vector.shape_cast %70 : vector<1x128xi1> to vector<1x128xi1>
    %72 = vector.broadcast %71 : vector<1x128xi1> to vector<4x128xi1>
    %73 = arith.select %72, %67, %68 : vector<4x128xi1>, vector<4x128xf32>
    %74 = arith.addf %66, %73 : vector<4x128xf32>
    %c4_i32_16 = arith.constant 4 : i32
    %75 = tpu.dynamic_rotate %74 by %c4_i32_16 dim 1 : vector<4x128xf32>, i32 -> vector<4x128xf32>
    %c100_i32_17 = arith.constant 100 : i32
    %76 = tpu.dynamic_rotate %74 by %c100_i32_17 dim 1 : vector<4x128xf32>, i32 -> vector<4x128xf32>
    %c4_i32_18 = arith.constant 4 : i32
    %77 = vector.broadcast %c4_i32_18 : i32 to vector<1x128xi32>
    %78 = arith.cmpi sge, %17, %77 : vector<1x128xi32>
    %79 = vector.shape_cast %78 : vector<1x128xi1> to vector<1x128xi1>
    %80 = vector.broadcast %79 : vector<1x128xi1> to vector<4x128xi1>
    %81 = arith.select %80, %75, %76 : vector<4x128xi1>, vector<4x128xf32>
    %82 = arith.addf %74, %81 : vector<4x128xf32>
    %c8_i32_19 = arith.constant 8 : i32
    %83 = tpu.dynamic_rotate %82 by %c8_i32_19 dim 1 : vector<4x128xf32>, i32 -> vector<4x128xf32>
    %c104_i32_20 = arith.constant 104 : i32
    %84 = tpu.dynamic_rotate %82 by %c104_i32_20 dim 1 : vector<4x128xf32>, i32 -> vector<4x128xf32>
    %c8_i32_21 = arith.constant 8 : i32
    %85 = vector.broadcast %c8_i32_21 : i32 to vector<1x128xi32>
    %86 = arith.cmpi sge, %17, %85 : vector<1x128xi32>
    %87 = vector.shape_cast %86 : vector<1x128xi1> to vector<1x128xi1>
    %88 = vector.broadcast %87 : vector<1x128xi1> to vector<4x128xi1>
    %89 = arith.select %88, %83, %84 : vector<4x128xi1>, vector<4x128xf32>
    %90 = arith.addf %82, %89 : vector<4x128xf32>
    %c16_i32_22 = arith.constant 16 : i32
    %91 = tpu.dynamic_rotate %90 by %c16_i32_22 dim 1 : vector<4x128xf32>, i32 -> vector<4x128xf32>
    %c112_i32_23 = arith.constant 112 : i32
    %92 = tpu.dynamic_rotate %90 by %c112_i32_23 dim 1 : vector<4x128xf32>, i32 -> vector<4x128xf32>
    %c16_i32_24 = arith.constant 16 : i32
    %93 = vector.broadcast %c16_i32_24 : i32 to vector<1x128xi32>
    %94 = arith.cmpi sge, %17, %93 : vector<1x128xi32>
    %95 = vector.shape_cast %94 : vector<1x128xi1> to vector<1x128xi1>
    %96 = vector.broadcast %95 : vector<1x128xi1> to vector<4x128xi1>
    %97 = arith.select %96, %91, %92 : vector<4x128xi1>, vector<4x128xf32>
    %98 = arith.addf %90, %97 : vector<4x128xf32>
    %cst = arith.constant 3.125000e-02 : f32
    %99 = vector.broadcast %cst : f32 to vector<4x128xf32>
    %100 = arith.mulf %57, %99 : vector<4x128xf32>
    %cst_25 = arith.constant 3.125000e-02 : f32
    %101 = vector.broadcast %cst_25 : f32 to vector<4x128xf32>
    %102 = arith.mulf %98, %101 : vector<4x128xf32>
    %103 = arith.mulf %100, %100 : vector<4x128xf32>
    %104 = arith.subf %102, %103 : vector<4x128xf32>
    %cst_26 = arith.constant 1.03225803 : f32
    %105 = vector.broadcast %cst_26 : f32 to vector<4x128xf32>
    %106 = arith.mulf %104, %105 : vector<4x128xf32>
    %cst_27 = arith.constant 0.000000e+00 : f32
    %107 = vector.broadcast %cst_27 : f32 to vector<4x128xf32>
    %108 = arith.maximumf %106, %107 : vector<4x128xf32>
    %109 = math.sqrt %108 : vector<4x128xf32>
    %cst_28 = arith.constant 9.99999997E-7 : f32
    %110 = vector.broadcast %cst_28 : f32 to vector<4x128xf32>
    %111 = arith.addf %109, %110 : vector<4x128xf32>
    %112 = tpu.reciprocal %111 : vector<4x128xf32> -> vector<4x128xf32>
    %113 = arith.subf %0, %100 : vector<4x128xf32>
    %114 = arith.mulf %113, %112 : vector<4x128xf32>
    %c0_29 = arith.constant 0 : index
    %c0_30 = arith.constant 0 : index
    %115 = vector.load %arg2[%c0_29, %c0_30] : memref<1x128xf32, #tpu.memory_space<vmem>>, vector<1x128xf32>
    %116 = vector.broadcast %115 : vector<1x128xf32> to vector<4x128xf32>
    %117 = arith.mulf %114, %116 : vector<4x128xf32>
    %c0_31 = arith.constant 0 : index
    %c0_32 = arith.constant 0 : index
    %118 = vector.load %arg3[%c0_31, %c0_32] : memref<1x128xf32, #tpu.memory_space<vmem>>, vector<1x128xf32>
    %119 = vector.broadcast %118 : vector<1x128xf32> to vector<4x128xf32>
    %120 = arith.addf %117, %119 : vector<4x128xf32>
    %c0_33 = arith.constant 0 : index
    %c0_34 = arith.constant 0 : index
    %121 = vector.load %arg4[%c0_33, %c0_34] : memref<4x128xf32, #tpu.memory_space<vmem>>, vector<4x128xf32>
    tpu.vector_store %arg4[%c0_33, %c0_34], %120 {strides = array<i32>} : memref<4x128xf32, #tpu.memory_space<vmem>>, vector<4x128xf32>,
    return
  }
  func.func @transform_0(%arg0: i32) -> (i32, i32) {
    %c0_i32 = arith.constant 0 : i32
    %c0_i32_0 = arith.constant 0 : i32
    return %arg0, %c0_i32 : i32, i32
  }
  func.func @transform_1(%arg0: i32) -> (i32, i32) {
    %c0_i32 = arith.constant 0 : i32
    %c0_i32_0 = arith.constant 0 : i32
    %c0_i32_1 = arith.constant 0 : i32
    return %c0_i32, %c0_i32_0 : i32, i32
  }
  func.func @transform_2(%arg0: i32) -> (i32, i32) {
    %c0_i32 = arith.constant 0 : i32
    %c0_i32_0 = arith.constant 0 : i32
    %c0_i32_1 = arith.constant 0 : i32
    return %c0_i32, %c0_i32_0 : i32, i32
  }
  func.func @transform_3(%arg0: i32) -> (i32, i32) {
    %c0_i32 = arith.constant 0 : i32
    %c0_i32_0 = arith.constant 0 : i32
    return %arg0, %c0_i32 : i32, i32
  }
}

</mosaic_0001>

<bundles_post_ra>
// kernel: tpu_custom_call.1
= control target key start
LH: loop header
LB: loop body
LE: loop exit
PB: predicated region body
PF: predicated region fallthrough
CT: control target
= control target key end

     0   :  { %8 = vsyncpa [#allocation3], 0  ;;  %s310_s0 = inlined_call_operand.hbm [shape: f32[4,128], index: 0, kind: input, shape index: {}]   ;;  %s311_s1 = inlined_call_operand.vmem [shape: f32[1,128], index: 1, kind: input, shape index: {}]   ;;  %s312_s2 = inlined_call_operand.vmem [shape: f32[1,128], index: 2, kind: input, shape index: {}]   ;;  %s313_s3 = inlined_call_operand.hbm [shape: f32[4,128], index: 3, kind: output, shape index: {}]  }
   0x1   :  { %9 = vsyncpa [#allocation4], 0  ;;  %s233_s12 = smov [#allocation2]   ;;  %s185_s16 = scalar_lea.hbm %s310_s0, 64 }
   0x2   :  { %s16_s13 = sshll.u32 %s233_s12, 4  ;;  %p186_p0 = scmp.ne.s32.totalorder %s310_s0, %s185_s16  ;;  %s17_s13 = int_to_ptr.vmem [resolvable:$true] %s16_s13 }
   0x3   :  { %p189_p1 = scmp.lt.u32.totalorder %s185_s16, %s310_s0 }
   0x5   :  { %p191_p2 = pnand %p189_p1, %p186_p0 }
   0x7   :  { %194 = shalt.err (!%p191_p2)
}
   0x8   :  { %s195_s21 = scalar_lea.vmem %s17_s13, 64  ;;  %p200_p4 = scmp.lt.s32.totalorder %s17_s13, %s17_s13 }
   0x9   :  { %p196_p3 = scmp.ne.s32.totalorder %s17_s13, %s195_s21  ;;  %p201_p5 = scmp.lt.s32.totalorder %s195_s21, %s195_s21 }
   0xb   :  { %p202_p6 = por %p201_p5, %p200_p4 }
   0xd   :  { %p203_p7 = pnand %p202_p6, %p196_p3 }
   0xf   :  { %206 = shalt.err (!%p203_p7)
}
  0x10   :  { %19 = dma.hbm_to_vmem [thread:$0]  %s310_s0, 64, %s17_s13, [#allocation3]  }
  0x11   :  { %229 = dma.done.wait [#allocation3], 64  }
  0x12   :  { %230 = vsyncadd [#allocation3], 4294967232  ;;  %v277_v0 = vld [vmem:[#allocation2] sm:$0xf]  ;;  %s234_s24 = smov 1   ;;  %s235_s25 = smov 97   ;;  %v28_v2 = vlaneseq }
  0x13   :  { %42 = vrot.lane.b32.xlu0 %v277_v0, %s234_s24  ;;  %v87_v1 = vmul.f32 %v277_v0, %v277_v0  ;;  %s236_s0 = smov 2   ;;  %s237_s26 = smov 98   ;;  %v167_v59 = vld [vmem:[%s311_s1] ss:$0 sm:$0xff] }
  0x14   :  { %v29_v3 = vand.u32 127, %v28_v2  ;;  %s238_s27 = smov 100   ;;  %s239_s28 = smov 4   ;;  %v168_v61 = vld [vmem:[%s312_s2] ss:$0 sm:$0xff] }
  0x15   :  { %88 = vrot.lane.b32.xlu1 %v87_v1, %s234_s24  ;;  %s240_s29 = smov 104   ;;  %s241_s30 = smov 8  }
  0x16   :  { %v283_v4 = vand.u32 31, %v29_v3  ;;  %s242_s4 = smov 112   ;;  %s243_s5 = smov 16  }
  0x17   :  { %44 = vrot.lane.b32.xlu0 %v277_v0, %s235_s25  ;;  %s244_s10 = smov [#allocation5]  }
  0x18   :  { %vm46_vm0 = vcmp.ge.s32.totalorder %v283_v4, 1  ;;  %vm55_vm1 = vcmp.ge.s32.totalorder %v283_v4, 2  ;;  %vm64_vm2 = vcmp.ge.s32.totalorder %v283_v4, 4  ;;  %vm73_vm3 = vcmp.ge.s32.totalorder %v283_v4, 8  ;;  %s158_s11 = sshll.u32 %s244_s10, 4  ;;  %s159_s11 = int_to_ptr.vmem [resolvable:$true] %s158_s11 }
  0x19   :  { %90 = vrot.lane.b32.xlu1 %v87_v1, %s235_s25  ;;  %vm82_vm4 = vcmp.ge.s32.totalorder %v283_v4, 16  ;;  %s207_s12 = scalar_lea.vmem %s159_s11, 64  ;;  %p212_p9 = scmp.lt.s32.totalorder %s159_s11, %s159_s11 }
  0x1a   :  { %p208_p8 = scmp.ne.s32.totalorder %s159_s11, %s207_s12  ;;  %p213_p10 = scmp.lt.s32.totalorder %s207_s12, %s207_s12 }
  0x1c   :  { %p214_p11 = por %p213_p10, %p212_p9 }
  0x1e   :  { %p215_p12 = pnand %p214_p11, %p208_p8 }
  0x85   :  { %v43_v5 = vpop.permute.xlu0 %42 }
  0x87   :  { %v89_v6 = vpop.permute.xlu1 %88 }
  0x89   :  { %v45_v7 = vpop.permute.xlu0 %44 }
  0x8a   :  { %v49_v8 = vsel %vm46_vm0, %v43_v5, %v45_v7 }
  0x8b   :  { %v50_v9 = vadd.f32 %v49_v8, %v277_v0  ;;  %v91_v10 = vpop.permute.xlu1 %90 }
  0x8c   :  { %v92_v11 = vsel %vm46_vm0, %v89_v6, %v91_v10 }
  0x8d   :  { %51 = vrot.lane.b32.xlu0 %v50_v9, %s236_s0  ;;  %53 = vrot.lane.b32.xlu1 %v50_v9, %s237_s26  ;;  %v93_v12 = vadd.f32 %v92_v11, %v87_v1 }
  0x91   :  { %96 = vrot.lane.b32.xlu1 %v93_v12, %s237_s26  ;;  %94 = vrot.lane.b32.xlu0 %v93_v12, %s236_s0 }
  0xff   :  { %v52_v13 = vpop.permute.xlu0 %51  ;;  %v54_v14 = vpop.permute.xlu1 %53 }
 0x100   :  { %v58_v15 = vsel %vm55_vm1, %v52_v13, %v54_v14 }
 0x101   :  { %v59_v16 = vadd.f32 %v58_v15, %v50_v9 }
 0x103   :  { %v95_v17 = vpop.permute.xlu0 %94  ;;  %62 = vrot.lane.b32.xlu1 %v59_v16, %s238_s27  ;;  %60 = vrot.lane.b32.xlu0 %v59_v16, %s239_s28  ;;  %v97_v18 = vpop.permute.xlu1 %96 }
 0x104   :  { %v98_v19 = vsel %vm55_vm1, %v95_v17, %v97_v18 }
 0x105   :  { %v99_v20 = vadd.f32 %v98_v19, %v93_v12 }
 0x107   :  { %102 = vrot.lane.b32.xlu1 %v99_v20, %s238_s27  ;;  %100 = vrot.lane.b32.xlu0 %v99_v20, %s239_s28 }
 0x175   :  { %v61_v21 = vpop.permute.xlu0 %60  ;;  %v63_v22 = vpop.permute.xlu1 %62 }
 0x176   :  { %v67_v23 = vsel %vm64_vm2, %v61_v21, %v63_v22 }
 0x177   :  { %v68_v24 = vadd.f32 %v67_v23, %v59_v16 }
 0x179   :  { %v101_v25 = vpop.permute.xlu0 %100  ;;  %71 = vrot.lane.b32.xlu1 %v68_v24, %s240_s29  ;;  %69 = vrot.lane.b32.xlu0 %v68_v24, %s241_s30  ;;  %v103_v26 = vpop.permute.xlu1 %102 }
 0x17a   :  { %v104_v27 = vsel %vm64_vm2, %v101_v25, %v103_v26 }
 0x17b   :  { %v105_v28 = vadd.f32 %v104_v27, %v99_v20 }
 0x17d   :  { %108 = vrot.lane.b32.xlu1 %v105_v28, %s240_s29  ;;  %106 = vrot.lane.b32.xlu0 %v105_v28, %s241_s30 }
 0x1eb   :  { %v70_v29 = vpop.permute.xlu0 %69  ;;  %v72_v30 = vpop.permute.xlu1 %71 }
 0x1ec   :  { %v76_v31 = vsel %vm73_vm3, %v70_v29, %v72_v30 }
 0x1ed   :  { %v77_v32 = vadd.f32 %v76_v31, %v68_v24 }
 0x1ef   :  { %v107_v33 = vpop.permute.xlu0 %106  ;;  %80 = vrot.lane.b32.xlu1 %v77_v32, %s242_s4  ;;  %78 = vrot.lane.b32.xlu0 %v77_v32, %s243_s5  ;;  %v109_v34 = vpop.permute.xlu1 %108 }
 0x1f0   :  { %v110_v35 = vsel %vm73_vm3, %v107_v33, %v109_v34 }
 0x1f1   :  { %v111_v36 = vadd.f32 %v110_v35, %v105_v28 }
 0x1f3   :  { %114 = vrot.lane.b32.xlu1 %v111_v36, %s242_s4  ;;  %112 = vrot.lane.b32.xlu0 %v111_v36, %s243_s5 }
 0x261   :  { %v79_v37 = vpop.permute.xlu0 %78  ;;  %v81_v38 = vpop.permute.xlu1 %80 }
 0x262   :  { %v85_v39 = vsel %vm82_vm4, %v79_v37, %v81_v38 }
 0x263   :  { %v86_v40 = vadd.f32 %v85_v39, %v77_v32 }
 0x265   :  { %v118_v41 = vmul.f32 0.03125, %v86_v40  ;;  %v113_v42 = vpop.permute.xlu0 %112  ;;  %v115_v43 = vpop.permute.xlu1 %114 }
 0x266   :  { %v116_v44 = vsel %vm82_vm4, %v113_v42, %v115_v43 }
 0x267   :  { %v117_v45 = vadd.f32 %v116_v44, %v111_v36  ;;  %v120_v46 = vmul.f32 %v118_v41, %v118_v41  ;;  %v133_v57 = vsub.f32 %v277_v0, %v118_v41 }
 0x269   :  { %v119_v47 = vmul.f32 0.03125, %v117_v45 }
 0x26b   :  { %v121_v48 = vsub.f32 %v119_v47, %v120_v46 }
 0x26d   :  { %v122_v49 = vmul.f32 1.032258, %v121_v48 }
 0x26f   :  { %v123_v50 = vmax.f32 %v122_v49, 0.0 }
 0x271   :  { %181 = vrsqrt.f32 %v123_v50  ;;  %vm126_vm5 = vcmp.eq.f32.partialorder %v123_v50, inf  ;;  %v129_v53 = vand.u32 2147483648, %v123_v50  ;;  %vm128_vm6 = vcmp.eq.f32.partialorder %v123_v50, 0.0 }
 0x27b   :  { %v182_v51 = vpop.eup %181 }
 0x27c   :  { %v125_v52 = vmul.f32 %v182_v51, %v123_v50 }
 0x27e   :  { %v127_v54 = vsel %vm126_vm5, %v123_v50, %v125_v52 }
 0x27f   :  { %v130_v55 = vsel %vm128_vm6, %v129_v53, %v127_v54 }
 0x280   :  { %v131_v56 = vadd.f32 1e-06, %v130_v55 }
 0x282   :  { %183 = vrcp.f32 %v131_v56 }
 0x28c   :  { %v184_v58 = vpop.eup %183 }
 0x28d   :  { %v134_v60 = vmul.f32 %v184_v58, %v133_v57 }
 0x28f   :  { %v142_v62 = vmul.f32 %v167_v59, %v134_v60 }
 0x291   :  { %v150_v63 = vadd.f32 %v168_v61, %v142_v62 }
 0x293   :  { %151 = vst [vmem:[#allocation5] sm:$0xf] %v150_v63 }
 0x294   :  { %218 = shalt.err (!%p215_p12)
}
 0x295   :  { %s219_s14 = scalar_lea.hbm %s313_s3, 64 }
 0x296   :  { %p220_p13 = scmp.ne.s32.totalorder %s313_s3, %s219_s14  ;;  %p223_p0 = scmp.lt.u32.totalorder %s219_s14, %s313_s3 }
 0x298   :  { %p225_p1 = pnand %p223_p0, %p220_p13 }
 0x29a   :  { %228 = shalt.err (!%p225_p1)
}
 0x29b   :  { %161 = dma.vmem_to_hbm [thread:$0]  %s159_s11, 64, %s313_s3, [#allocation4]  }
 0x29c   :  { %231 = dma.done.wait [#allocation4], 64  }
 0x29d   :  { %232 = vsyncadd [#allocation4], 4294967232 }
 0x29e   :  { %165 = vsyncpa [#allocation3], 1 }
 0x29f   :  { %166 = vsyncpa [#allocation4], 1 }

</bundles_post_ra>
